<compile_context>
chip_gen: v7x
topology: tpu7x:2x2x1
jax: 0.10.0
libtpu: 0.0.40
codegen_flags: <defaults>
</compile_context>

<pallas_src>
import jax
import jax.numpy as jnp
import numpy as np
from jax import lax
from jax.experimental import pallas as pl
from jax.experimental.pallas import tpu as pltpu

_SMEM_SPEC = pl.BlockSpec(memory_space=pltpu.MemorySpace.SMEM)


def _round_up(x, m):
    return ((x + m - 1) // m) * m


def _pick_tile(n_pad, target):
    """Largest multiple of 128 that divides n_pad and is <= max(target, 128)."""
    t = min(target, n_pad)
    t = max(128, t - (t % 128))
    while n_pad % t:
        t -= 128
    return t


# ---------------------------------------------------------------------------
# shared in-kernel helpers
# ---------------------------------------------------------------------------
def _rbf_tile(x_rows, y_cols_t, lengthscale, outputscale):
    """ScaleKernel(RBF) tile K(x, y): x_rows (tm, d), y_cols_t (d, tn) -> (tm, tn).

    Direct per-feature differences (d is 2-3): numerically stable (no norm-based
    cancellation) and pure VPU broadcasts, so the MXU stays free for the quad form.
    """
    inv = 1.0 / lengthscale
    tm, d = x_rows.shape
    tn = y_cols_t.shape[-1]
    d2 = jnp.zeros((tm, tn), jnp.float32)
    for k in range(d):                                   # static unroll, d is tiny
        diff = x_rows[:, k:k + 1] * inv - y_cols_t[k:k + 1, :] * inv
        d2 = d2 + diff * diff
    return outputscale * jnp.exp(-0.5 * d2)


def _khatri_rao_tile(a, b, pa, pb):
    """Column-wise Kronecker: out[(p*Mi+q), n] = a[p, n] * b[q, n].

    Built with two tiny 0/1 selection matmuls (layout-safe, no in-kernel
    (Ml, Mi, T) -> (M, T) reshape)."""
    a_rep = jnp.dot(pa, a, preferred_element_type=jnp.float32)   # (M, T)
    b_til = jnp.dot(pb, b, preferred_element_type=jnp.float32)   # (M, T)
    return a_rep * b_til


# ---------------------------------------------------------------------------
# Pallas kernel 1: RBF cross-covariance K(X, Y), column-tiled
# ---------------------------------------------------------------------------
def _rbf_cross_kernel(hp_ref, x_ref, yt_ref, k_ref):
    k_ref[...] = _rbf_tile(x_ref[...], yt_ref[...], hp_ref[0], hp_ref[1])


def rbf_cross(x, y, lengthscale, outputscale, col_tile=256):
    """K(x, y) for ScaleKernel(RBFKernel): x (r, d) rows, y (c, d) cols -> (r, c)."""
    x = jnp.asarray(x, jnp.float32)
    y = jnp.asarray(y, jnp.float32)
    r, d = x.shape
    c = y.shape[0]
    yt = y.T                                            # (d, c): column points, lane-major
    hp = jnp.array([lengthscale, outputscale], jnp.float32)
    tc = _pick_tile(c, col_tile) if c % 128 == 0 else c
    return pl.pallas_call(
        _rbf_cross_kernel,
        grid=(c // tc,),
        in_specs=[
            _SMEM_SPEC,                                 # hyperparameters in SMEM
            pl.BlockSpec((r, d), lambda j: (0, 0)),
            pl.BlockSpec((d, tc), lambda j: (0, j)),
        ],
        out_specs=pl.BlockSpec((r, tc), lambda j: (0, j)),
        out_shape=jax.ShapeDtypeStruct((r, c), jnp.float32),
        compiler_params=pltpu.CompilerParams(dimension_semantics=("parallel",)),
    )(hp, x, yt)


# ---------------------------------------------------------------------------
# Pallas kernel 2: predictive mean, lane-dense (1, N) output
# ---------------------------------------------------------------------------
def _mean_kernel(mt_ref, a_ref, b_ref, mean_ref):
    # mean[n] = sum_{p,q} m[p*Mi+q] A[p,n] B[q,n] = sum_q (m_mat^T @ A)[q,n] * B[q,n]
    c = jnp.dot(mt_ref[...], a_ref[...], preferred_element_type=jnp.float32)   # (Mi, T)
    mean_ref[...] = jnp.sum(c * b_ref[...], axis=0, keepdims=True)             # (1, T)


def predictive_mean(a, b, m_mat_t, tile):
    ml, n_pad = a.shape
    mi = b.shape[0]
    return pl.pallas_call(
        _mean_kernel,
        grid=(n_pad // tile,),
        in_specs=[
            pl.BlockSpec((mi, ml), lambda j: (0, 0)),
            pl.BlockSpec((ml, tile), lambda j: (0, j)),
            pl.BlockSpec((mi, tile), lambda j: (0, j)),
        ],
        out_specs=pl.BlockSpec((1, tile), lambda j: (0, j)),   # lane-dense output
        out_shape=jax.ShapeDtypeStruct((1, n_pad), jnp.float32),
        compiler_params=pltpu.CompilerParams(dimension_semantics=("parallel",)),
    )(m_mat_t, a, b)


# ---------------------------------------------------------------------------
# Pallas kernel 3: predictive covariance, tiled 2-D grid over (N, N)
#   covar = Kff_l * Kff_i + jitter*I + interp^T (S - I) interp
# ---------------------------------------------------------------------------
def _covar_kernel(hp_ref, latr_ref, latct_ref, inpr_ref, inpct_ref,
                  ai_ref, aj_ref, bi_ref, bj_ref, pa_ref, pb_ref, mid_ref, cov_ref):
    ls_l, os_l, ls_i, os_i, jitter = (hp_ref[0], hp_ref[1], hp_ref[2],
                                      hp_ref[3], hp_ref[4])

    # Kff tiles fused in-kernel: no N x N Kff_latent / Kff_input arrays in HBM.
    kff_l = _rbf_tile(latr_ref[...], latct_ref[...], ls_l, os_l)      # (Ti, Tj)
    kff_i = _rbf_tile(inpr_ref[...], inpct_ref[...], ls_i, os_i)      # (Ti, Tj)

    pa, pb = pa_ref[...], pb_ref[...]
    interp_i = _khatri_rao_tile(ai_ref[...], bi_ref[...], pa, pb)     # (M, Ti) f32
    interp_j = _khatri_rao_tile(aj_ref[...], bj_ref[...], pa, pb)     # (M, Tj) f32

    # quad = interp_i^T @ (S - I) @ interp_j : bf16 MXU operands, f32 accumulation.
    tmp = jnp.dot(mid_ref[...], interp_j.astype(jnp.bfloat16),
                  preferred_element_type=jnp.float32)                 # (M, Tj)
    dn_t = (((0,), (0,)), ((), ()))                                   # contract dim 0
    quad = lax.dot_general(interp_i.astype(jnp.bfloat16), tmp.astype(jnp.bfloat16),
                           dn_t, preferred_element_type=jnp.float32)  # (Ti, Tj)

    cov_ref[...] = kff_l * kff_i + quad

    # jitter * I exists only on diagonal tiles.
    @pl.when(pl.program_id(0) == pl.program_id(1))
    def _():
        t0, t1 = cov_ref.shape
        row = lax.broadcasted_iota(jnp.int32, (t0, t1), 0)
        col = lax.broadcasted_iota(jnp.int32, (t0, t1), 1)
        cov_ref[...] = cov_ref[...] + jnp.where(row == col, jitter, jnp.float32(0.0))


def predictive_covar(lat_p, inp_p, a, b, pa, pb, middle_bf16, hp, tile):
    n_pad, d_l = lat_p.shape
    d_i = inp_p.shape[1]
    ml, mi = a.shape[0], b.shape[0]
    m = middle_bf16.shape[0]
    g = n_pad // tile
    lat_t = lat_p.T
    inp_t = inp_p.T
    return pl.pallas_call(
        _covar_kernel,
        grid=(g, g),
        in_specs=[
            _SMEM_SPEC,                                               # hyperparameters
            pl.BlockSpec((tile, d_l), lambda i, j: (i, 0)),           # latent rows
            pl.BlockSpec((d_l, tile), lambda i, j: (0, j)),           # latent cols (pre-T)
            pl.BlockSpec((tile, d_i), lambda i, j: (i, 0)),           # input rows
            pl.BlockSpec((d_i, tile), lambda i, j: (0, j)),           # input cols (pre-T)
            pl.BlockSpec((ml, tile), lambda i, j: (0, i)),            # A, row-side slab
            pl.BlockSpec((ml, tile), lambda i, j: (0, j)),            # A, col-side slab
            pl.BlockSpec((mi, tile), lambda i, j: (0, i)),            # B, row-side slab
            pl.BlockSpec((mi, tile), lambda i, j: (0, j)),            # B, col-side slab
            pl.BlockSpec((m, ml), lambda i, j: (0, 0)),               # selection P_a
            pl.BlockSpec((m, mi), lambda i, j: (0, 0)),               # selection P_b
            pl.BlockSpec((m, m), lambda i, j: (0, 0)),                # middle = S - I (bf16)
        ],
        out_specs=pl.BlockSpec((tile, tile), lambda i, j: (i, j)),
        out_shape=jax.ShapeDtypeStruct((n_pad, n_pad), jnp.float32),
        compiler_params=pltpu.CompilerParams(
            dimension_semantics=("parallel", "parallel")),
    )(hp, lat_p, lat_t, inp_p, inp_t, a, a, b, b, pa, pb, middle_bf16)


# ---------------------------------------------------------------------------
# Forward pass (glue + Pallas kernels)
# ---------------------------------------------------------------------------
def kronecker_variational_forward(latents, inputs, inducing_points_latent,
                                  inducing_points_input, inducing_values,
                                  variational_inducing_covar,
                                  ls_latent, os_latent, ls_input, os_input,
                                  jitter=1e-4, tile=256):
    n = latents.shape[-2]
    assert inputs.shape[-2] == n
    ml, mi = inducing_points_latent.shape[-2], inducing_points_input.shape[-2]
    m = ml * mi
    d_l, d_i = latents.shape[-1], inputs.shape[-1]

    latents = jnp.asarray(latents, jnp.float32)
    inputs = jnp.asarray(inputs, jnp.float32)
    z_l = jnp.asarray(inducing_points_latent, jnp.float32)
    z_i = jnp.asarray(inducing_points_input, jnp.float32)

    # Pad the minibatch axis to a lane-aligned size; padded rows/cols are finite garbage
    # and are sliced away at the end.
    n_pad = _round_up(n, 128)
    t = _pick_tile(n_pad, tile)
    lat_p = jnp.zeros((n_pad, d_l), jnp.float32).at[:n].set(latents)
    inp_p = jnp.zeros((n_pad, d_i), jnp.float32).at[:n].set(inputs)

    # Only the covariance blocks we actually need (no (N+M)^2 matrix + slicing).
    kuu_l = rbf_cross(z_l, z_l, ls_latent, os_latent)                  # (Ml, Ml)
    kuu_i = rbf_cross(z_i, z_i, ls_input, os_input)                    # (Mi, Mi)
    kuf_l = rbf_cross(z_l, lat_p, ls_latent, os_latent, col_tile=t)    # (Ml, n_pad)
    kuf_i = rbf_cross(z_i, inp_p, ls_input, os_input, col_tile=t)      # (Mi, n_pad)

    # Cholesky + triangular solve on tiny (Ml, Ml)/(Mi, Mi) factors (plain JAX).
    # TODO(synk): gpytorch's psd_safe_cholesky adaptive-jitter retry (max_tries=4) is
    #             replaced by a single fixed jitter.
    cj = jnp.float32(1e-6)
    l_l = jnp.linalg.cholesky(kuu_l + cj * jnp.eye(ml, dtype=jnp.float32))
    l_i = jnp.linalg.cholesky(kuu_i + cj * jnp.eye(mi, dtype=jnp.float32))
    l_l_inv = jax.scipy.linalg.solve_triangular(l_l, jnp.eye(ml, dtype=jnp.float32), lower=True)
    l_i_inv = jax.scipy.linalg.solve_triangular(l_i, jnp.eye(mi, dtype=jnp.float32), lower=True)

    # Khatri-Rao identity: interp[(p*Mi+q), n] = A[p, n] * B[q, n] with
    # A = L_l_inv @ Kuf_l, B = L_i_inv @ Kuf_i.  kron(L_l_inv, L_i_inv) and the (M, N)
    # Kuf / interp matrices are never materialized.
    a = jnp.dot(l_l_inv, kuf_l)                                        # (Ml, n_pad)
    b = jnp.dot(l_i_inv, kuf_i)                                        # (Mi, n_pad)

    # 0/1 selection matrices for the in-kernel Khatri-Rao expansion (tiny, constant).
    pa = jnp.asarray(np.kron(np.eye(ml, dtype=np.float32), np.ones((mi, 1), np.float32)))
    pb = jnp.asarray(np.kron(np.ones((ml, 1), np.float32), np.eye(mi, dtype=np.float32)))

    # middle term (S - I), pre-cast to bf16 (MXU operand; halves its DMA/VMEM footprint).
    # TODO(synk): for very large M, stream `middle` over a blocked reduction axis instead
    #             of keeping the full (M, M) operand VMEM-resident (v7x 64 MiB budget).
    middle = (jnp.asarray(variational_inducing_covar, jnp.float32)
              - jnp.eye(m, dtype=jnp.float32)).astype(jnp.bfloat16)

    m_mat_t = jnp.asarray(inducing_values, jnp.float32).reshape(ml, mi).T   # (Mi, Ml)
    hp = jnp.array([ls_latent, os_latent, ls_input, os_input, jitter], jnp.float32)

    mean_pad = predictive_mean(a, b, m_mat_t, t)                       # (1, n_pad)
    covar_pad = predictive_covar(lat_p, inp_p, a, b, pa, pb, middle, hp, t)

    return mean_pad[0, :n], covar_pad[:n, :n]


# ---------------------------------------------------------------------------
# Pure-JAX reference (original kron formulation) for a sanity check
# ---------------------------------------------------------------------------
def _rbf_ref(x, ls, os_):
    xs = x / ls
    d2 = jnp.sum((xs[:, None, :] - xs[None, :, :]) ** 2, axis=-1)
    return os_ * jnp.exp(-0.5 * d2)


def _reference(latents, inputs, Z_l, Z_i, m_vec, S, ls_l, os_l, ls_i, os_i, jitter):
    N = latents.shape[-2]
    Ml, Mi = Z_l.shape[-2], Z_i.shape[-2]
    M = Ml * Mi
    K_l = _rbf_ref(jnp.concatenate([latents, Z_l], -2), ls_l, os_l)
    K_i = _rbf_ref(jnp.concatenate([inputs, Z_i], -2), ls_i, os_i)
    Kuu_l, Kuu_i = K_l[N:, N:], K_i[N:, N:]
    Kff = K_l[:N, :N] * K_i[:N, :N]
    Kuf = (K_l[N:, :N][:, None, :] * K_i[N:, :N][None, :, :]).reshape(M, N)
    L_l = jnp.linalg.cholesky(Kuu_l + 1e-6 * jnp.eye(Ml))
    L_i = jnp.linalg.cholesky(Kuu_i + 1e-6 * jnp.eye(Mi))
    L_inv = jnp.kron(
        jax.scipy.linalg.solve_triangular(L_l, jnp.eye(Ml), lower=True),
        jax.scipy.linalg.solve_triangular(L_i, jnp.eye(Mi), lower=True))
    interp = L_inv @ Kuf
    mean = interp.T @ m_vec
    covar = Kff + jitter * jnp.eye(N) + interp.T @ (S - jnp.eye(M)) @ interp
    return mean, covar


if __name__ == "__main__":
    key = jax.random.PRNGKey(0)
    ks = jax.random.split(key, 6)

    # small shapes: minibatch N=200 (padded to 256 -> a 2x2 covar tile grid at tile=128),
    # d_latent=3, d_input=2, 4 x 8 = 32 inducing points.
    N, d_l, d_i, Ml, Mi = 200, 3, 2, 4, 8
    M = Ml * Mi

    latents = jax.random.normal(ks[0], (N, d_l), jnp.float32)
    inputs = jax.random.normal(ks[1], (N, d_i), jnp.float32)
    Z_latent = jax.random.normal(ks[2], (Ml, d_l), jnp.float32)
    Z_input = jax.random.normal(ks[3], (Mi, d_i), jnp.float32)

    # deterministic synthetic variational distribution q(u) = N(m, S), S = L L^T
    inducing_values = 0.1 * jax.random.normal(ks[4], (M,), jnp.float32)
    L_var = jnp.tril(0.05 * jax.random.normal(ks[5], (M, M), jnp.float32)) \
        + jnp.eye(M, dtype=jnp.float32)
    S = L_var @ L_var.T

    # deterministic kernel hyperparameters (ScaleKernel(RBFKernel) for each factor)
    ls_latent, os_latent = 1.2, 1.5
    ls_input, os_input = 0.9, 0.8
    jitter = 1e-4

    mean, covar = kronecker_variational_forward(
        latents, inputs, Z_latent, Z_input, inducing_values, S,
        ls_latent, os_latent, ls_input, os_input, jitter, tile=128)
    jax.block_until_ready((mean, covar))

    ref_mean, ref_covar = _reference(
        latents, inputs, Z_latent, Z_input, inducing_values, S,
        ls_latent, os_latent, ls_input, os_input, jitter)

    np.testing.assert_allclose(np.asarray(mean), np.asarray(ref_mean), rtol=2e-3, atol=2e-3)
    # quadratic form uses bf16 MXU operands (f32 accumulation) -> widened tolerance.
    np.testing.assert_allclose(np.asarray(covar), np.asarray(ref_covar), rtol=2e-2, atol=2e-2)
    assert mean.shape == (N,) and covar.shape == (N, N)
    print("KERNEL_OK")
</pallas_src>

<mosaic_0001>
module attributes {stable_mosaic.version = 11 : i64} {
  func.func @_rbf_cross_kernel(%arg0: i32, %arg1: memref<2xf32, #tpu.memory_space<smem>>, %arg2: memref<4x3xf32, #tpu.memory_space<vmem>>, %arg3: memref<3x4xf32, #tpu.memory_space<vmem>>, %arg4: memref<4x4xf32, #tpu.memory_space<vmem>>) attributes {dimension_semantics = [#tpu.dimension_semantics<parallel>], iteration_bounds = array<i64: 1>, scalar_prefetch = 0 : i64, scratch_operands = 0 : i64, tpu.core_type = #tpu.core_type<tc>, window_params = [{transform_indices = @transform_0, window_bounds = array<i64: 2>}, {pipeline_mode = #tpu.pipeline_mode<synchronous>, transform_indices = @transform_1, window_bounds = array<i64: 4, 3>}, {transform_indices = @transform_2, window_bounds = array<i64: 3, 4>}, {transform_indices = @transform_3, window_bounds = array<i64: 4, 4>}]} {
    %c0 = arith.constant 0 : index
    %c0_0 = arith.constant 0 : index
    %0 = vector.load %arg2[%c0, %c0_0] : memref<4x3xf32, #tpu.memory_space<vmem>>, vector<4x3xf32>
    %c0_1 = arith.constant 0 : index
    %c0_2 = arith.constant 0 : index
    %1 = vector.load %arg3[%c0_1, %c0_2] : memref<3x4xf32, #tpu.memory_space<vmem>>, vector<3x4xf32>
    %c0_3 = arith.constant 0 : index
    %2 = memref.load %arg1[%c0_3] : memref<2xf32, #tpu.memory_space<smem>>
    %c1 = arith.constant 1 : index
    %3 = memref.load %arg1[%c1] : memref<2xf32, #tpu.memory_space<smem>>
    %cst = arith.constant 1.000000e+00 : f32
    %4 = arith.divf %cst, %2 : f32
    %cst_4 = arith.constant 0.000000e+00 : f32
    %5 = vector.broadcast %cst_4 : f32 to vector<4x4xf32>
    %6 = vector.extract_strided_slice %0 {offsets = [0, 0], sizes = [4, 1], strides = [1, 1]} : vector<4x3xf32> to vector<4x1xf32>
    %7 = vector.broadcast %4 : f32 to vector<4x1xf32>
    %8 = arith.mulf %6, %7 : vector<4x1xf32>
    %9 = vector.extract_strided_slice %1 {offsets = [0, 0], sizes = [1, 4], strides = [1, 1]} : vector<3x4xf32> to vector<1x4xf32>
    %10 = vector.broadcast %4 : f32 to vector<1x4xf32>
    %11 = arith.mulf %9, %10 : vector<1x4xf32>
    %12 = vector.broadcast %8 : vector<4x1xf32> to vector<4x4xf32>
    %13 = vector.broadcast %11 : vector<1x4xf32> to vector<4x4xf32>
    %14 = arith.subf %12, %13 : vector<4x4xf32>
    %15 = arith.mulf %14, %14 : vector<4x4xf32>
    %16 = arith.addf %5, %15 : vector<4x4xf32>
    %17 = vector.extract_strided_slice %0 {offsets = [0, 1], sizes = [4, 1], strides = [1, 1]} : vector<4x3xf32> to vector<4x1xf32>
    %18 = vector.broadcast %4 : f32 to vector<4x1xf32>
    %19 = arith.mulf %17, %18 : vector<4x1xf32>
    %20 = vector.extract_strided_slice %1 {offsets = [1, 0], sizes = [1, 4], strides = [1, 1]} : vector<3x4xf32> to vector<1x4xf32>
    %21 = vector.broadcast %4 : f32 to vector<1x4xf32>
    %22 = arith.mulf %20, %21 : vector<1x4xf32>
    %23 = vector.broadcast %19 : vector<4x1xf32> to vector<4x4xf32>
    %24 = vector.broadcast %22 : vector<1x4xf32> to vector<4x4xf32>
    %25 = arith.subf %23, %24 : vector<4x4xf32>
    %26 = arith.mulf %25, %25 : vector<4x4xf32>
    %27 = arith.addf %16, %26 : vector<4x4xf32>
    %28 = vector.extract_strided_slice %0 {offsets = [0, 2], sizes = [4, 1], strides = [1, 1]} : vector<4x3xf32> to vector<4x1xf32>
    %29 = vector.broadcast %4 : f32 to vector<4x1xf32>
    %30 = arith.mulf %28, %29 : vector<4x1xf32>
    %31 = vector.extract_strided_slice %1 {offsets = [2, 0], sizes = [1, 4], strides = [1, 1]} : vector<3x4xf32> to vector<1x4xf32>
    %32 = vector.broadcast %4 : f32 to vector<1x4xf32>
    %33 = arith.mulf %31, %32 : vector<1x4xf32>
    %34 = vector.broadcast %30 : vector<4x1xf32> to vector<4x4xf32>
    %35 = vector.broadcast %33 : vector<1x4xf32> to vector<4x4xf32>
    %36 = arith.subf %34, %35 : vector<4x4xf32>
    %37 = arith.mulf %36, %36 : vector<4x4xf32>
    %38 = arith.addf %27, %37 : vector<4x4xf32>
    %cst_5 = arith.constant -5.000000e-01 : f32
    %39 = vector.broadcast %cst_5 : f32 to vector<4x4xf32>
    %40 = arith.mulf %39, %38 : vector<4x4xf32>
    %41 = math.exp %40 : vector<4x4xf32>
    %42 = vector.broadcast %3 : f32 to vector<4x4xf32>
    %43 = arith.mulf %42, %41 : vector<4x4xf32>
    %c0_6 = arith.constant 0 : index
    %c0_7 = arith.constant 0 : index
    %44 = vector.load %arg4[%c0_6, %c0_7] : memref<4x4xf32, #tpu.memory_space<vmem>>, vector<4x4xf32>
    tpu.vector_store %arg4[%c0_6, %c0_7], %43 {strides = array<i32>} : memref<4x4xf32, #tpu.memory_space<vmem>>, vector<4x4xf32>,
    return
  }
  func.func @transform_0(%arg0: i32) -> i32 {
    %c0_i32 = arith.constant 0 : i32
    %c0_i32_0 = arith.constant 0 : i32
    return %c0_i32 : i32
  }
  func.func @transform_1(%arg0: i32) -> (i32, i32) {
    %c0_i32 = arith.constant 0 : i32
    %c0_i32_0 = arith.constant 0 : i32
    %c0_i32_1 = arith.constant 0 : i32
    return %c0_i32, %c0_i32_0 : i32, i32
  }
  func.func @transform_2(%arg0: i32) -> (i32, i32) {
    %c0_i32 = arith.constant 0 : i32
    %c0_i32_0 = arith.constant 0 : i32
    return %c0_i32, %arg0 : i32, i32
  }
  func.func @transform_3(%arg0: i32) -> (i32, i32) {
    %c0_i32 = arith.constant 0 : i32
    %c0_i32_0 = arith.constant 0 : i32
    return %c0_i32, %arg0 : i32, i32
  }
}

</mosaic_0001>

<bundles_post_ra>
// kernel: tpu_custom_call.1
= control target key start
LH: loop header
LB: loop body
LE: loop exit
PB: predicated region body
PF: predicated region fallthrough
CT: control target
= control target key end

     0   :  { %8 = vsyncpa [#allocation5], 0  ;;  %s247_s0 = inlined_call_operand.hbm [shape: f32[2], index: 0, kind: input, shape index: {}]   ;;  %s248_s1 = inlined_call_operand.hbm [shape: f32[4,3], index: 1, kind: input, shape index: {}]   ;;  %s249_s2 = inlined_call_operand.vmem [shape: f32[3,4], index: 2, kind: input, shape index: {}]   ;;  %s250_s3 = inlined_call_operand.hbm [shape: f32[4,4], index: 3, kind: output, shape index: {}]  }
   0x1   :  { %9 = vsyncpa [#allocation3], 0 }
   0x2   :  { %10 = vsyncpa [#allocation4], 0  ;;  %s122_s14 = scalar_lea.hbm %s247_s0, 16 }
   0x3   :  { %p123_p0 = scmp.ne.s32.totalorder %s247_s0, %s122_s14  ;;  %p126_p1 = scmp.lt.u32.totalorder %s122_s14, %s247_s0 }
   0x5   :  { %p128_p2 = pnand %p126_p1, %p123_p0 }
   0x7   :  { %131 = shalt.err (!%p128_p2)
}
   0x8   :  { %s182_s19 = smov [#allocation2]   ;;  %s183_s22 = smov [#allocation6]  }
   0x9   :  { %18 = dma.hbm_to_smem %s247_s0, 16, %s182_s19, [#allocation5]  }
   0xa   :  { %s25_s23 = sshll.u32 %s183_s22, 4  ;;  %s132_s26 = scalar_lea.hbm %s248_s1, 64  ;;  %s26_s23 = int_to_ptr.vmem [resolvable:$true] %s25_s23 }
   0xb   :  { %p133_p3 = scmp.ne.s32.totalorder %s248_s1, %s132_s26  ;;  %p136_p4 = scmp.lt.u32.totalorder %s132_s26, %s248_s1 }
   0xd   :  { %p138_p5 = pnand %p136_p4, %p133_p3 }
   0xf   :  { %141 = shalt.err (!%p138_p5)
}
  0x10   :  { %s142_s4 = scalar_lea.vmem %s26_s23, 64  ;;  %p147_p7 = scmp.lt.s32.totalorder %s26_s23, %s26_s23 }
  0x11   :  { %p143_p6 = scmp.ne.s32.totalorder %s26_s23, %s142_s4  ;;  %p148_p8 = scmp.lt.s32.totalorder %s142_s4, %s142_s4 }
  0x13   :  { %p149_p9 = por %p148_p8, %p147_p7 }
  0x15   :  { %p150_p10 = pnand %p149_p9, %p143_p6 }
  0x17   :  { %153 = shalt.err (!%p150_p10)
}
  0x18   :  { %28 = dma.hbm_to_vmem [thread:$0]  %s248_s1, 64, %s26_s23, [#allocation3]  }
  0x19   :  { %176 = dma.done.wait [#allocation5], 16  }
  0x1a   :  { %177 = vsyncadd [#allocation5], 4294967280 }
  0x1b   :  { %178 = dma.done.wait [#allocation3], 64  }
  0x1c   :  { %179 = vsyncadd [#allocation3], 4294967232 }
  0x1d   :  { %37 = sfence }
  0x1e   :  { %s40_s6 = sld [smem:[#allocation2]]  ;;  %v184_v0 = vmov 2   ;;  %v185_v1 = vmov 0   ;;  %v38_v4 = vld [vmem:[#allocation6] sm:$0xf]  ;;  %v186_v7 = vmov 1   ;;  %v53_v8 = vlaneseq }
  0x1f   :  { %116 = vset.pattern.permute.xlu1 %v184_v0  ;;  %114 = vset.pattern.permute.xlu0 %v185_v1  ;;  %v39_v10 = vld [vmem:[%s249_s2] sm:$0x7]  ;;  %s105_s2 = sld [smem:[#allocation2 + $0x1]]  ;;  %s187_s9 = smov [#allocation7]   ;;  %vm87_vm0 = vcmask 27648  }
  0x20   :  { %v54_v9 = vshrl.u32 %v53_v8, 7  ;;  %s95_s10 = sshll.u32 %s187_s9, 4  ;;  %s96_s10 = int_to_ptr.vmem [resolvable:$true] %s95_s10 }
  0x21   :  { %s154_s11 = scalar_lea.vmem %s96_s10, 64  ;;  %p159_p12 = scmp.lt.s32.totalorder %s96_s10, %s96_s10 }
  0x22   :  { %v55_v12 = vsub.s32 0, %v54_v9  ;;  %v77_v13 = vsub.s32 2, %v54_v9  ;;  %v66_v15 = vsub.s32 1, %v54_v9  ;;  %p155_p11 = scmp.ne.s32.totalorder %s96_s10, %s154_s11  ;;  %p160_p13 = scmp.lt.s32.totalorder %s154_s11, %s154_s11 }
  0x24   :  { %v42_v2 = vstv %s40_s6  ;;  %p161_p0 = por %p160_p13, %p159_p12 }
  0x25   :  { %118 = vrcp.f32 %v42_v2  ;;  %v85_v31 = vstv %s105_s2 }
  0x26   :  { %p162_p1 = pnand %p161_p0, %p155_p11 }
  0x2f   :  { %v119_v3 = vpop.eup %118 }
  0x30   :  { %106 = vpush %v119_v3 }
  0x61   :  { %s107_s7 = spop %106 }
  0x62   :  { %v45_v5 = vstv %s107_s7 }
  0x63   :  { %v46_v6 = vmul.f32 %v45_v5, %v38_v4  ;;  %v47_v11 = vmul.f32 %v45_v5, %v39_v10 }
  0x65   :  { %72 = vperm.xlu1 %116, %v46_v6   ;;  %50 = vperm.xlu0 %114, %v46_v6   ;;  %v56_v16 = vrot.slane %v47_v11, %v55_v12  ;;  %v78_v18 = vrot.slane %v47_v11, %v77_v13  ;;  %v67_v20 = vrot.slane %v47_v11, %v66_v15 }
  0x69   :  { %115 = vset.pattern.permute.xlu0 %v186_v7 }
  0x6a   :  { %61 = vperm.xlu0 %115, %v46_v6  }
  0x6e   :  { %117 = vset.pattern.permute.xlu0 %v184_v0 }
  0xe4   :  { %v51_v14 = vpop.permute.xlu0 %50  ;;  %v73_v17 = vpop.permute.xlu1 %72 }
  0xe5   :  { %v57_v19 = vsub.f32 %v51_v14, %v56_v16  ;;  %v79_v22 = vsub.f32 %v73_v17, %v78_v18 }
  0xe7   :  { %v58_v24 = vmul.f32 %v57_v19, %v57_v19  ;;  %v80_v26 = vmul.f32 %v79_v22, %v79_v22 }
  0xe9   :  { %v62_v21 = vpop.permute.xlu0 %61 }
  0xea   :  { %v68_v23 = vsub.f32 %v62_v21, %v67_v20 }
  0xec   :  { %v69_v25 = vmul.f32 %v68_v23, %v68_v23 }
  0xee   :  { %v70_v27 = vadd.f32 %v69_v25, %v58_v24 }
  0xf0   :  { %v81_v28 = vadd.f32 %v80_v26, %v70_v27 }
  0xf2   :  { %v82_v29 = vmul.f32 -0.5, %v81_v28 }
  0xf4   :  { %v83_v30 = vmul.f32 1.442695, %v82_v29 }
  0xf6   :  { %120 = vpow2.f32 %v83_v30 }
 0x100   :  { %v121_v32 = vpop.eup %120 }
 0x101   :  { %v86_v33 = vmul.f32 %v121_v32, %v85_v31 }
 0x103   :  { %88 = vst.msk [vmem:[#allocation7] sm:$0xf] %vm87_vm0, %v86_v33 }
 0x104   :  { %165 = shalt.err (!%p162_p1)
}
 0x105   :  { %s166_s14 = scalar_lea.hbm %s250_s3, 64 }
 0x106   :  { %p167_p2 = scmp.ne.s32.totalorder %s250_s3, %s166_s14  ;;  %p170_p3 = scmp.lt.u32.totalorder %s166_s14, %s250_s3 }
 0x108   :  { %p172_p4 = pnand %p170_p3, %p167_p2 }
 0x10a   :  { %175 = shalt.err (!%p172_p4)
}
 0x10b   :  { %98 = dma.vmem_to_hbm [thread:$0]  %s96_s10, 64, %s250_s3, [#allocation4]  }
 0x10c   :  { %180 = dma.done.wait [#allocation4], 64  }
 0x10d   :  { %181 = vsyncadd [#allocation4], 4294967232 }
 0x10e   :  { %102 = vsyncpa [#allocation3], 1 }
 0x10f   :  { %103 = vsyncpa [#allocation4], 1 }
 0x110   :  { %104 = vsyncpa [#allocation5], 1 }

</bundles_post_ra>
